<compile_context>
chip_gen: v5e
topology: v5e:2x2
jax: 0.10.0
libtpu: 0.0.40
codegen_flags: <defaults>
</compile_context>

<pallas_src>
import jax
import jax.numpy as jnp
from jax.experimental import pallas as pl
from jax.experimental.pallas import tpu as pltpu


def _identity_copy_kernel(x_ref, o_ref):
    # The entire hot path of IdentityLayer: pass the tile through unchanged.
    o_ref[...] = x_ref[...]


# Lane widths to try (all multiples of 128 -> unmasked, lane-dense stores).
_LANE_CANDIDATES = (2048, 1024, 512, 256, 128)

# ~2 MiB per tile: with double-buffered input + output (4 live buffers) this
# stays far under v7x's 32 MiB default scoped VMEM (and v5e's 16 MiB).
_TARGET_TILE_BYTES = 2 * 1024 * 1024


def _pick_lanes(total):
    for lanes in _LANE_CANDIDATES:
        if total % lanes == 0:
            return lanes
    return None


def _tiled_identity_2d(x2d):
    """Tiled, pipelined, lane-dense VMEM copy of a (rows, lanes) slab."""
    rows, lanes = x2d.shape
    row_bytes = lanes * jnp.dtype(x2d.dtype).itemsize
    # Multiple of 8 sublanes, ~2 MiB per tile; fall back to full extent
    # when the whole array is smaller than one tile.
    block_rows = max(8, (_TARGET_TILE_BYTES // row_bytes) // 8 * 8)
    block_rows = min(rows, block_rows)
    grid = (pl.cdiv(rows, block_rows),)

    return pl.pallas_call(
        _identity_copy_kernel,
        out_shape=jax.ShapeDtypeStruct((rows, lanes), x2d.dtype),
        grid=grid,
        in_specs=[pl.BlockSpec((block_rows, lanes), lambda i: (i, 0))],
        out_specs=pl.BlockSpec((block_rows, lanes), lambda i: (i, 0)),
        # Output aliases the input buffer: no extra HBM allocation and
        # (under donation) no HBM round-trip for the identity.
        input_output_aliases={0: 0},
        compiler_params=pltpu.CompilerParams(
            dimension_semantics=("parallel",),
        ),
    )(x2d)


@jax.jit
def identity_layer_forward(x: jax.Array) -> jax.Array:
    """IdentityLayer.forward(x) -> x, executed as a tiled Pallas copy kernel."""
    orig_shape = x.shape
    total = x.size
    if total == 0:
        # Zero-sized tensor: nothing to move.
        return x

    flat = x.reshape(total)
    lanes = _pick_lanes(total)
    if lanes is None:
        # Remainder path: pad up to a lane-dense multiple, copy, slice back.
        lanes = 128
        padded = ((total + lanes - 1) // lanes) * lanes
        flat_p = jnp.pad(flat, (0, padded - total))
        out = _tiled_identity_2d(flat_p.reshape(padded // lanes, lanes))
        return out.reshape(padded)[:total].reshape(orig_shape)

    out = _tiled_identity_2d(flat.reshape(total // lanes, lanes))
    return out.reshape(orig_shape)


class IdentityLayer:
    """JAX/Pallas mirror of the PyTorch IdentityLayer module.

    All __init__ args are stored for API parity but (exactly like the PyTorch
    reference) are unused in forward — there are no parameters.
    """

    def __init__(self, in_channels, out_channels, stride=1, padding=0,
                 use_bn=False, act_func=None, dropout_rate=0.0):
        self.in_channels = in_channels
        self.out_channels = out_channels
        self.stride = stride
        self.padding = padding
        self.use_bn = use_bn
        self.act_func = act_func
        self.dropout_rate = dropout_rate

    def __call__(self, x):
        return identity_layer_forward(x)


if __name__ == "__main__":
    key = jax.random.PRNGKey(0)
    # Small NCHW input consistent with a conv-style layer: batch=2, C=4, H=W=16
    x = jax.random.normal(key, (2, 4, 16, 16), dtype=jnp.float32)

    layer = IdentityLayer(in_channels=4, out_channels=4)
    y = layer(x)
    y = jax.block_until_ready(y)

    assert y.shape == x.shape and y.dtype == x.dtype
    assert bool(jnp.array_equal(y, x))
    print("KERNEL_OK")
</pallas_src>

<mosaic_0001>
module attributes {stable_mosaic.version = 11 : i64} {
  func.func @_identity_copy_kernel(%arg0: i32, %arg1: memref<1x2048xf32, #tpu.memory_space<vmem>>, %arg2: memref<1x2048xf32, #tpu.memory_space<vmem>>) attributes {dimension_semantics = [#tpu.dimension_semantics<parallel>], iteration_bounds = array<i64: 1>, scalar_prefetch = 0 : i64, scratch_operands = 0 : i64, tpu.core_type = #tpu.core_type<tc>, window_params = [{transform_indices = @transform_0, window_bounds = array<i64: 1, 2048>}, {transform_indices = @transform_1, window_bounds = array<i64: 1, 2048>}]} {
    %c0 = arith.constant 0 : index
    %c0_0 = arith.constant 0 : index
    %0 = vector.load %arg1[%c0, %c0_0] : memref<1x2048xf32, #tpu.memory_space<vmem>>, vector<1x2048xf32>
    %c0_1 = arith.constant 0 : index
    %c0_2 = arith.constant 0 : index
    %1 = vector.load %arg2[%c0_1, %c0_2] : memref<1x2048xf32, #tpu.memory_space<vmem>>, vector<1x2048xf32>
    tpu.vector_store %arg2[%c0_1, %c0_2], %0 {strides = array<i32>} : memref<1x2048xf32, #tpu.memory_space<vmem>>, vector<1x2048xf32>,
    return
  }
  func.func @transform_0(%arg0: i32) -> (i32, i32) {
    %c0_i32 = arith.constant 0 : i32
    %c0_i32_0 = arith.constant 0 : i32
    return %arg0, %c0_i32 : i32, i32
  }
  func.func @transform_1(%arg0: i32) -> (i32, i32) {
    %c0_i32 = arith.constant 0 : i32
    %c0_i32_0 = arith.constant 0 : i32
    return %arg0, %c0_i32 : i32, i32
  }
}

</mosaic_0001>

<bundles_post_ra>
// kernel: identity_layer_forward.1
= control target key start
LH: loop header
LB: loop body
LE: loop exit
PB: predicated region body
PF: predicated region fallthrough
CT: control target
= control target key end

     0   :  { %s38_s0 = inlined_call_operand.vmem [shape: f32[1,2048], index: 0, kind: input, shape index: {}, may-alias: {0,1}]   ;;  %s39_s1 = inlined_call_operand.vmem [shape: f32[1,2048], index: 1, kind: output, shape index: {}, may-alias: {0,1}]  }
   0x1   :  { %v8_v0 = vld [vmem:[%s38_s0] sm:$0xff]  ;;  %v9_v1 = vld [vmem:[%s38_s0 + $0x8] sm:$0xff] }
   0x2   :  { %10 = vst [vmem:[%s39_s1] sm:$0xff] %v8_v0 }
   0x3   :  { %11 = vst [vmem:[%s39_s1 + $0x8] sm:$0xff] %v9_v1 }

</bundles_post_ra>
